<compile_context>
chip_gen: v7x
topology: tpu7x:2x2x1
jax: 0.10.0
libtpu: 0.0.40
codegen_flags: <defaults>
</compile_context>

<pallas_src>
import functools
import math

import jax
import jax.numpy as jnp
from jax.experimental import pallas as pl
from jax.experimental.pallas import tpu as pltpu


def _attn_kernel(qt_ref, k_ref, v_ref, o_ref, *, scale):
    # qt: (Hblk, T, ch) sequence-major; k, v, o: (Hblk, ch, T) channel-major.
    # scale is applied to both q and k in the reference -> fold scale^2 into q once.
    qt = qt_ref[...].astype(jnp.float32) * (scale * scale)
    k = k_ref[...].astype(jnp.float32)
    v = v_ref[...].astype(jnp.float32)

    # logits[h, t, s] = sum_c q[h, c, t] * k[h, c, s]   (batched NN matmul on the MXU)
    logits = jnp.einsum("htc,hcs->hts", qt, k, preferred_element_type=jnp.float32)

    # Numerically stable softmax over s, in float32 (matches torch.softmax(weight.float())).
    logits = logits - jnp.max(logits, axis=-1, keepdims=True)
    p = jnp.exp(logits)
    p = p / jnp.sum(p, axis=-1, keepdims=True)

    # out[h, c, t] = sum_s v[h, c, s] * p[h, t, s]      (batched NT matmul on the MXU)
    a = jnp.einsum("hcs,hts->hct", v, p, preferred_element_type=jnp.float32)
    o_ref[...] = a.astype(o_ref.dtype)


def _vmem_limit_bytes():
    # Generation-aware budget: v5e/v6e have 128 MiB VMEM, v7x only 64 MiB per TensorCore.
    try:
        cap = pltpu.get_tpu_info().vmem_capacity_bytes
    except Exception:
        cap = 64 * 1024 * 1024  # conservative fallback (v7x per-TC VMEM)
    return min(int(cap * 3 // 4), 96 * 1024 * 1024)


def _pick_block_heads(bh, ch, t, itemsize, budget_bytes):
    """Largest head-block that fits the VMEM budget, divides the head count,
    and keeps >=2 grid steps (so both TensorCores get work on v7x)."""
    # q/k/v/out tiles double-buffered by the pipeline + f32 in-kernel working set.
    per_head = 4 * ch * t * itemsize * 2 + (3 * ch * t + 2 * t * t) * 4
    hmax = max(1, budget_bytes // per_head)
    if bh >= 2:
        hmax = min(hmax, bh // 2)
    hmax = max(1, min(hmax, bh))
    best = 1
    for d in range(1, hmax + 1):
        if bh % d == 0:
            best = d
    return best


def self_attention(x, num_head):
    """x: (batch, 3*channel, length). Returns (batch, channel, length)."""
    B, C3, T = x.shape
    assert C3 % 3 == 0, "channel axis must hold q, k, v stacked (divisible by 3)"
    C = C3 // 3
    assert C % num_head == 0, "channel must be divisible by num_head"
    ch = C // num_head
    BH = B * num_head
    scale = 1.0 / math.sqrt(math.sqrt(ch))

    qkv = x.reshape(B, 3, num_head, ch, T)
    # q sequence-major so the QK^T matmul is the canonical NN form in the kernel.
    q_t = qkv[:, 0].transpose(0, 1, 3, 2).reshape(BH, T, ch)
    k = qkv[:, 1].reshape(BH, ch, T)
    v = qkv[:, 2].reshape(BH, ch, T)

    vmem_limit = _vmem_limit_bytes()
    hblk = _pick_block_heads(BH, ch, T, x.dtype.itemsize, vmem_limit // 2)
    grid = (BH // hblk,)

    qt_spec = pl.BlockSpec((hblk, T, ch), lambda i: (i, 0, 0))
    kv_spec = pl.BlockSpec((hblk, ch, T), lambda i: (i, 0, 0))

    out = pl.pallas_call(
        functools.partial(_attn_kernel, scale=scale),
        out_shape=jax.ShapeDtypeStruct((BH, ch, T), x.dtype),
        grid_spec=pltpu.PrefetchScalarGridSpec(
            num_scalar_prefetch=0,
            grid=grid,
            in_specs=[qt_spec, kv_spec, kv_spec],
            out_specs=pl.BlockSpec((hblk, ch, T), lambda i: (i, 0, 0)),
        ),
        compiler_params=pltpu.CompilerParams(
            dimension_semantics=("parallel",),
            vmem_limit_bytes=vmem_limit,
        ),
    )(q_t, k, v)

    return out.reshape(B, C, T)


def self_attention_ref(x, num_head):
    """Pure-JAX reference mirroring the PyTorch forward."""
    B, C3, T = x.shape
    C = C3 // 3
    ch = C // num_head
    scale = 1.0 / math.sqrt(math.sqrt(ch))
    q = (x[:, :C, :] * scale).reshape(B * num_head, ch, T)
    k = (x[:, C:2 * C, :] * scale).reshape(B * num_head, ch, T)
    v = x[:, 2 * C:, :].reshape(B * num_head, ch, T)
    w = jnp.einsum("bct,bcs->bts", q, k, precision=jax.lax.Precision.HIGHEST)
    w = jax.nn.softmax(w.astype(jnp.float32), axis=-1).astype(w.dtype)
    a = jnp.einsum("bts,bcs->bct", w, v, precision=jax.lax.Precision.HIGHEST)
    return a.reshape(B, -1, T)


if __name__ == "__main__":
    key = jax.random.PRNGKey(0)

    batch = 2
    channel = 64                     # module constructor arg -> num_head = 2, head_dim = 32
    num_head = channel // 32
    length = 16
    x = jax.random.normal(key, (batch, 3 * channel, length), dtype=jnp.float32)

    y = self_attention(x, num_head)
    y = jax.block_until_ready(y)

    y_ref = self_attention_ref(x, num_head)
    assert y.shape == (batch, channel, length)
    assert jnp.allclose(y, y_ref, atol=1e-3, rtol=1e-3), float(jnp.max(jnp.abs(y - y_ref)))

    print("KERNEL_OK")
</pallas_src>

<mosaic_0001>
module attributes {stable_mosaic.version = 11 : i64} {
  func.func @_attn_kernel(%arg0: i32, %arg1: memref<2x16x32xf32, #tpu.memory_space<vmem>>, %arg2: memref<2x32x16xf32, #tpu.memory_space<vmem>>, %arg3: memref<2x32x16xf32, #tpu.memory_space<vmem>>, %arg4: memref<2x32x16xf32, #tpu.memory_space<vmem>>) attributes {dimension_semantics = [#tpu.dimension_semantics<parallel>], iteration_bounds = array<i64: 2>, scalar_prefetch = 0 : i64, scratch_operands = 0 : i64, tpu.core_type = #tpu.core_type<tc>, window_params = [{transform_indices = @transform_0, window_bounds = array<i64: 2, 16, 32>}, {transform_indices = @transform_1, window_bounds = array<i64: 2, 32, 16>}, {transform_indices = @transform_2, window_bounds = array<i64: 2, 32, 16>}, {transform_indices = @transform_3, window_bounds = array<i64: 2, 32, 16>}]} {
    %c0 = arith.constant 0 : index
    %c0_0 = arith.constant 0 : index
    %c0_1 = arith.constant 0 : index
    %0 = vector.load %arg1[%c0, %c0_0, %c0_1] : memref<2x16x32xf32, #tpu.memory_space<vmem>>, vector<2x16x32xf32>
    %cst = arith.constant 0.176776692 : f32
    %1 = vector.broadcast %cst : f32 to vector<2x16x32xf32>
    %2 = arith.mulf %0, %1 : vector<2x16x32xf32>
    %c0_2 = arith.constant 0 : index
    %c0_3 = arith.constant 0 : index
    %c0_4 = arith.constant 0 : index
    %3 = vector.load %arg2[%c0_2, %c0_3, %c0_4] : memref<2x32x16xf32, #tpu.memory_space<vmem>>, vector<2x32x16xf32>
    %c0_5 = arith.constant 0 : index
    %c0_6 = arith.constant 0 : index
    %c0_7 = arith.constant 0 : index
    %4 = vector.load %arg3[%c0_5, %c0_6, %c0_7] : memref<2x32x16xf32, #tpu.memory_space<vmem>>, vector<2x32x16xf32>
    "tpu.trace_start"() <{level = 10 : i32, message = "htc,hcs->hts"}> : () -> ()
    %cst_8 = arith.constant dense<0.000000e+00> : vector<2x16x16xf32>
    %5 = tpu.matmul %2, %3, %cst_8 {dimension_numbers = #tpu.dot_dimension_numbers<[2], [1], [1], [2], [0, 0, 0, 1, 1, 2], [0], [0]>} : vector<2x16x32xf32>, vector<2x32x16xf32>, vector<2x16x16xf32> -> vector<2x16x16xf32>
    "tpu.trace_stop"() : () -> ()
    %cst_9 = arith.constant dense<0xFF800000> : vector<2x16xf32>
    %6 = vector.multi_reduction <maximumf>, %5, %cst_9 [2] : vector<2x16x16xf32> to vector<2x16xf32>
    %7 = vector.shape_cast %6 : vector<2x16xf32> to vector<2x16x1xf32>
    %8 = vector.broadcast %7 : vector<2x16x1xf32> to vector<2x16x16xf32>
    %9 = arith.subf %5, %8 : vector<2x16x16xf32>
    %10 = math.exp %9 : vector<2x16x16xf32>
    %cst_10 = arith.constant dense<0.000000e+00> : vector<2x16xf32>
    %11 = vector.multi_reduction <add>, %10, %cst_10 [2] : vector<2x16x16xf32> to vector<2x16xf32>
    %12 = vector.shape_cast %11 : vector<2x16xf32> to vector<2x16x1xf32>
    %13 = vector.broadcast %12 : vector<2x16x1xf32> to vector<2x16x16xf32>
    %14 = arith.divf %10, %13 : vector<2x16x16xf32>
    "tpu.trace_start"() <{level = 10 : i32, message = "hcs,hts->hct"}> : () -> ()
    %cst_11 = arith.constant dense<0.000000e+00> : vector<2x32x16xf32>
    %15 = tpu.matmul %4, %14, %cst_11 {dimension_numbers = #tpu.dot_dimension_numbers<[2], [2], [1], [1], [0, 0, 0, 1, 1, 1], [0], [0]>} : vector<2x32x16xf32>, vector<2x16x16xf32>, vector<2x32x16xf32> -> vector<2x32x16xf32>
    "tpu.trace_stop"() : () -> ()
    %c0_12 = arith.constant 0 : index
    %c0_13 = arith.constant 0 : index
    %c0_14 = arith.constant 0 : index
    %16 = vector.load %arg4[%c0_12, %c0_13, %c0_14] : memref<2x32x16xf32, #tpu.memory_space<vmem>>, vector<2x32x16xf32>
    tpu.vector_store %arg4[%c0_12, %c0_13, %c0_14], %15 {strides = array<i32>} : memref<2x32x16xf32, #tpu.memory_space<vmem>>, vector<2x32x16xf32>,
    return
  }
  func.func @transform_0(%arg0: i32) -> (i32, i32, i32) {
    %c0_i32 = arith.constant 0 : i32
    %c0_i32_0 = arith.constant 0 : i32
    %c0_i32_1 = arith.constant 0 : i32
    return %arg0, %c0_i32, %c0_i32_0 : i32, i32, i32
  }
  func.func @transform_1(%arg0: i32) -> (i32, i32, i32) {
    %c0_i32 = arith.constant 0 : i32
    %c0_i32_0 = arith.constant 0 : i32
    %c0_i32_1 = arith.constant 0 : i32
    return %arg0, %c0_i32, %c0_i32_0 : i32, i32, i32
  }
  func.func @transform_2(%arg0: i32) -> (i32, i32, i32) {
    %c0_i32 = arith.constant 0 : i32
    %c0_i32_0 = arith.constant 0 : i32
    %c0_i32_1 = arith.constant 0 : i32
    return %arg0, %c0_i32, %c0_i32_0 : i32, i32, i32
  }
  func.func @transform_3(%arg0: i32) -> (i32, i32, i32) {
    %c0_i32 = arith.constant 0 : i32
    %c0_i32_0 = arith.constant 0 : i32
    %c0_i32_1 = arith.constant 0 : i32
    return %arg0, %c0_i32, %c0_i32_0 : i32, i32, i32
  }
}

</mosaic_0001>

<bundles_post_ra>
// kernel: tpu_custom_call.1
= control target key start
LH: loop header
LB: loop body
LE: loop exit
PB: predicated region body
PF: predicated region fallthrough
CT: control target
= control target key end

     0   :  { %s942_s12 = smov 0   ;;  %s1010_s0 = inlined_call_operand.vmem [shape: f32[4,16,32], index: 0, kind: input, shape index: {}]   ;;  %s1011_s1 = inlined_call_operand.vmem [shape: f32[4,32,16], index: 1, kind: input, shape index: {}]   ;;  %s1012_s2 = inlined_call_operand.vmem [shape: f32[4,32,16], index: 2, kind: input, shape index: {}]   ;;  %s1013_s3 = inlined_call_operand.vmem [shape: f32[4,32,16], index: 3, kind: output, shape index: {}]  }
   0x1 LB: > { %s757_s13 = sadd.s32 4294967295, %s920_s12   ;;  %p761_p0 = scmp.ge.s32.totalorder %s920_s12, 1  ;;  %s920_s12 = sphi %s942_s12, %s13_s12  }
   0x2   : > { %p163_p1 = scmp.lt.s32.totalorder %s920_s12, 3 }
   0x4   : > { %p164_p2 = pnand %p761_p0, %p163_p1 }
   0x5   : > { %s762_s14 = sshll.u32 (!%p164_p2), %s757_s13, 1  ;;  %vm253_vm0 = vcmask (!%p164_p2), 261120   ;;  %vm416_vm1 = vcmask (!%p164_p2), 130048  }
   0x6   : > { %167 = sbr.rel (%p164_p2) target bundleno = 790 (0x316), region = 32  ;;  %p202_p3 = scmp.lt.s32.totalorder (!%p164_p2), %s762_s14, 3  ;;  %vm879_vm2 = vmpackc.low (!%p164_p2), %vm416_vm1, %vm416_vm1 }
   0xd   : > { %s1015_s14 = smov (!%p202_p3, %s762_s14), 3 }
   0xe   : > { %s950_s15 = sshll.u32 %s1015_s14, 5  ;;  %s792_s16 = sshll.u32 %s1015_s14, 4 }
   0xf   : > { %s213_s19 = scalar_lea.vmem %s1011_s1, %s950_s15  ;;  %s206_s22 = scalar_lea.vmem %s1010_s0, %s792_s16 }
  0x10   : > { %v237_v0 = vld [vmem:[%s213_s19] sm:$0xff]  ;;  %v238_v1 = vld [vmem:[%s213_s19 + $0x8] sm:$0xff]  ;;  %v239_v5 = vld [vmem:[%s213_s19 + $0x10] sm:$0xff]  ;;  %s975_s25 = scalar_lea.vmem %s1012_s2, %s950_s15  ;;  %s227_s28 = scalar_lea.vmem %s1013_s3, %s950_s15 }
  0x11   : > { %v241_v2 = vld [vmem:[%s213_s19 + $0x20] sm:$0xff]  ;;  %v862_v3 = vpack.c.bf16 %v238_v1, %v237_v0  ;;  %v242_v4 = vld [vmem:[%s213_s19 + $0x28] sm:$0xff]  ;;  %v240_v6 = vld [vmem:[%s213_s19 + $0x18] sm:$0xff] }
  0x12   : > { %v870_v7 = vpack.c.bf16 %v242_v4, %v241_v2  ;;  %v866_v8 = vpack.c.bf16 %v240_v6, %v239_v5  ;;  %v243_v9 = vld [vmem:[%s213_s19 + $0x30] sm:$0xff]  ;;  %v244_v10 = vld [vmem:[%s213_s19 + $0x38] sm:$0xff]  ;;  %v229_v11 = vld [vmem:[%s206_s22] sm:$0xff] }
  0x13   : > { %863 = vmatprep.subr.bf16.mxu0 %v862_v3  ;;  %v874_v12 = vpack.c.bf16 %v244_v10, %v243_v9  ;;  %v233_v13 = vmul.f32 0.17677669, %v229_v11  ;;  %v231_v14 = vld [vmem:[%s206_s22 + $0x10] sm:$0xff]  ;;  %v230_v16 = vld [vmem:[%s206_s22 + $0x8] sm:$0xff]  ;;  %v232_v17 = vld [vmem:[%s206_s22 + $0x18] sm:$0xff] }
  0x14   : > { %871 = vmatprep.subr.bf16.mxu1 %v870_v7  ;;  %865 = vmatpush3.bf16.msra.mxu0 %v862_v3  ;;  %v235_v15 = vmul.f32 0.17677669, %v231_v14  ;;  %v234_v18 = vmul.f32 0.17677669, %v230_v16  ;;  %v236_v19 = vmul.f32 0.17677669, %v232_v17 }
  0x15   : > { %873 = vmatpush3.bf16.msra.mxu1 %v870_v7  ;;  %867 = vmatprep.subr.bf16.mxu0 %v866_v8  ;;  %v245_v48 = vld [vmem:[%s975_s25] sm:$0xff]  ;;  %v246_v0 = vld [vmem:[%s975_s25 + $0x8] sm:$0xff]  ;;  %v247_v1 = vld [vmem:[%s975_s25 + $0x10] sm:$0xff] }
  0x16   : > { %875 = vmatprep.subr.bf16.mxu1 %v874_v12  ;;  %828 = vmatprep.mubr.msk.f32.mxu0 %vm253_vm0, %v233_v13  ;;  %v249_v49 = vld [vmem:[%s975_s25 + $0x20] sm:$0xff]  ;;  %v250_v2 = vld [vmem:[%s975_s25 + $0x28] sm:$0xff]  ;;  %v248_v3 = vld [vmem:[%s975_s25 + $0x18] sm:$0xff] }
  0x17   : > { %839 = vmatprep.mubr.msk.f32.mxu1 %vm253_vm0, %v235_v15  ;;  %v251_v4 = vld [vmem:[%s975_s25 + $0x30] sm:$0xff]  ;;  %v252_v5 = vld [vmem:[%s975_s25 + $0x38] sm:$0xff] }
  0x18   : > { %869 = vmatpush3.bf16.msra.mxu0 %v866_v8 }
  0x19   : > { %877 = vmatpush3.bf16.msra.mxu1 %v874_v12 }
  0x1b   : > { %829 = vmatmul.mubr.msk.f32.vlgmr.msra.gmra.mrb[0].mxu0 %vm253_vm0, %v234_v18 }
  0x1c   : > { %840 = vmatmul.mubr.msk.f32.vlgmr.msra.gmra.mrb[0].mxu1 %vm253_vm0, %v236_v19  ;;  %846 = vmatprep.mubr.msk.f32.mxu0 %vm416_vm1, %v245_v48 }
  0x1d   : > { %856 = vmatprep.mubr.msk.f32.mxu1 %vm416_vm1, %v249_v49 }
  0xee   : > { %v830_v20 = vpop.f32.mrb[0].mxu0 }
  0xef   : > { %v841_v21 = vpop.f32.mrb[0].mxu1  ;;  %v326_v22 = vpop.f32.mrb[1].mxu0  ;;  %v420_v27 = vsel %vm416_vm1, %v830_v20, -inf }
  0xf0   : > { %v407_v23 = vpop.f32.mrb[1].mxu1  ;;  %v417_v24 = vsel %vm416_vm1, %v326_v22, -inf  ;;  %v426_v26 = vsel %vm416_vm1, %v841_v21, -inf }
  0xf1   : > { %v423_v25 = vsel %vm416_vm1, %v407_v23, -inf  ;;  %418 = vmax.xlane.f32.xlu0 %v417_v24 }
  0xf2   : > { %424 = vmax.xlane.f32.xlu1 %v423_v25 }
  0xf5   : > { %421 = vmax.xlane.f32.xlu0 %v420_v27 }
  0xf6   : > { %427 = vmax.xlane.f32.xlu1 %v426_v26 }
 0x17e   : > { %v419_v28 = vpop.xlane.xlu0 %418 }
 0x17f   : > { %v425_v29 = vpop.xlane.xlu1 %424  ;;  %v429_v30 = vsub.f32 %v326_v22, %v419_v28 }
 0x180   : > { %v431_v31 = vsub.f32 %v407_v23, %v425_v29 }
 0x181   : > { %v433_v32 = vmul.f32 1.442695, %v429_v30 }
 0x182   : > { %v437_v33 = vmul.f32 1.442695, %v431_v31  ;;  %v422_v34 = vpop.xlane.xlu0 %421 }
 0x183   : > { %898 = vpow2.f32 %v433_v32  ;;  %v428_v35 = vpop.xlane.xlu1 %427  ;;  %v430_v36 = vsub.f32 %v830_v20, %v422_v34 }
 0x184   : > { %v432_v37 = vsub.f32 %v841_v21, %v428_v35  ;;  %900 = vpow2.f32 %v437_v33 }
 0x185   : > { %v435_v38 = vmul.f32 1.442695, %v430_v36 }
 0x186   : > { %v439_v39 = vmul.f32 1.442695, %v432_v37 }
 0x187   : > { %902 = vpow2.f32 %v435_v38 }
 0x188   : > { %904 = vpow2.f32 %v439_v39 }
 0x18d   : > { %v899_v40 = vpop.eup %898 }
 0x18e   : > { %v441_v41 = vsel %vm416_vm1, %v899_v40, 0.0  ;;  %v901_v42 = vpop.eup %900 }
 0x18f   : > { %442 = vadd.xlane.f32.xlu0 %v441_v41  ;;  %v447_v44 = vsel %vm416_vm1, %v901_v42, 0.0 }
 0x191   : > { %v903_v43 = vpop.eup %902 }
 0x192   : > { %v444_v45 = vsel %vm416_vm1, %v903_v43, 0.0  ;;  %v905_v46 = vpop.eup %904 }
 0x193   : > { %448 = vadd.xlane.f32.xlu0 %v447_v44  ;;  %445 = vadd.xlane.f32.xlu1 %v444_v45  ;;  %v450_v47 = vsel %vm416_vm1, %v905_v46, 0.0 }
 0x197   : > { %451 = vadd.xlane.f32.xlu1 %v450_v47 }
 0x21c   : > { %v443_v50 = vpop.xlane.xlu0 %442 }
 0x21d   : > { %906 = vrcp.f32 %v443_v50 }
 0x220   : > { %v446_v51 = vpop.xlane.xlu1 %445  ;;  %v449_v52 = vpop.xlane.xlu0 %448 }
 0x221   : > { %908 = vrcp.f32 %v446_v51 }
 0x222   : > { %910 = vrcp.f32 %v449_v52 }
 0x224   : > { %v452_v53 = vpop.xlane.xlu1 %451 }
 0x225   : > { %912 = vrcp.f32 %v452_v53 }
 0x227   : > { %v907_v54 = vpop.eup %906 }
 0x228   : > { %v454_v56 = vmul.f32 %v907_v54, %v899_v40 }
 0x22b   : > { %v909_v55 = vpop.eup %908 }
 0x22c   : > { %v456_v57 = vmul.f32 %v909_v55, %v903_v43  ;;  %v911_v58 = vpop.eup %910 }
 0x22d   : > { %v458_v61 = vmul.f32 %v911_v58, %v901_v42 }
 0x22e   : > { %v878_v59 = vpack.c.bf16 %v456_v57, %v454_v56 }
 0x22f   : > { %v913_v60 = vpop.eup %912 }
 0x230   : > { %880 = vmatprep.subr.msk.bf16.mxu0 %vm879_vm2, %v878_v59  ;;  %v460_v62 = vmul.f32 %v913_v60, %v905_v46 }
 0x231   : > { %883 = vmatpush3.bf16.xpose.msk.msra.mxu0 %vm879_vm2, %v878_v59 }
 0x232   : > { %v884_v63 = vpack.c.bf16 %v460_v62, %v458_v61 }
 0x234   : > { %886 = vmatprep.subr.msk.bf16.mxu1 %vm879_vm2, %v884_v63 }
 0x235   : > { %889 = vmatpush3.bf16.xpose.msk.msra.mxu1 %vm879_vm2, %v884_v63 }
 0x238   : > { %847 = vmatmul.mubr.msk.f32.vlgmr.msra.gmra.mrb[2].mxu0 %vm416_vm1, %v246_v0 }
 0x239   : > { %849 = vmatprep.mubr.msk.f32.mxu0 %vm416_vm1, %v247_v1 }
 0x23c   : > { %857 = vmatmul.mubr.msk.f32.vlgmr.msra.gmra.mrb[2].mxu1 %vm416_vm1, %v250_v2  ;;  %850 = vmatmul.mubr.msk.f32.gmra.mrb[4].mxu0 %vm416_vm1, %v248_v3 }
 0x23d   : > { %859 = vmatprep.mubr.msk.f32.mxu1 %vm416_vm1, %v251_v4 }
 0x240   : > { %860 = vmatmul.mubr.msk.f32.gmra.mrb[4].mxu1 %vm416_vm1, %v252_v5 }
 0x30b   : > { %v848_v6 = vpop.f32.mrb[2].mxu0 }
 0x30c   : > { %668 = vst.msk [vmem:[%s227_s28 + $0x8] sm:$0xff] %vm416_vm1, %v848_v6  ;;  %v545_v7 = vpop.f32.mrb[3].mxu0 }
 0x30d   : > { %667 = vst.msk [vmem:[%s227_s28] sm:$0xff] %vm416_vm1, %v545_v7 }
 0x30f   : > { %v858_v8 = vpop.f32.mrb[2].mxu1  ;;  %v851_v9 = vpop.f32.mrb[4].mxu0 }
 0x310   : > { %672 = vst.msk [vmem:[%s227_s28 + $0x28] sm:$0xff] %vm416_vm1, %v858_v8  ;;  %v648_v10 = vpop.f32.mrb[3].mxu1  ;;  %670 = vst.msk [vmem:[%s227_s28 + $0x18] sm:$0xff] %vm416_vm1, %v851_v9  ;;  %v555_v11 = vpop.f32.mrb[5].mxu0 }
 0x311   : > { %671 = vst.msk [vmem:[%s227_s28 + $0x20] sm:$0xff] %vm416_vm1, %v648_v10  ;;  %669 = vst.msk [vmem:[%s227_s28 + $0x10] sm:$0xff] %vm416_vm1, %v555_v11 }
 0x313   : > { %v861_v12 = vpop.f32.mrb[4].mxu1 }
 0x314   : > { %674 = vst.msk [vmem:[%s227_s28 + $0x38] sm:$0xff] %vm416_vm1, %v861_v12  ;;  %v658_v13 = vpop.f32.mrb[5].mxu1 }
 0x315   : > { %673 = vst.msk [vmem:[%s227_s28 + $0x30] sm:$0xff] %vm416_vm1, %v658_v13 }
 0x316 PF: > { %s13_s12 = sadd.s32 1, %s920_s12  }
 0x317   : > { %p10_p4 = scmp.ge.s32.totalorder %s13_s12, 4  }
 0x319   :  { %12 = sbr.rel (!%p10_p4) target bundleno = 1 (0x1), region = 68 }

</bundles_post_ra>
